<compile_context>
chip_gen: v6e
topology: v6e:2x2x1
jax: 0.10.0
libtpu: 0.0.40
codegen_flags: <defaults>
</compile_context>

<pallas_src>
import jax
import jax.numpy as jnp
from jax.experimental import pallas as pl
from jax.experimental.pallas import tpu as pltpu


def one_step_lstm_kernel(x_ref, wih_ref, whh_ref, b_ref, wfc_ref, bfc_ref, out_ref):
    # x_ref:   (T*B, D_in) f32, time-major flattened (rows t*B .. t*B+B-1 = step t)
    # wih_ref: (D_in, 4H)  f32, g-gate columns pre-scaled by 2
    # whh_ref: (H, 4H)     f32, g-gate columns pre-scaled by 2
    # b_ref:   (1, 4H)     f32, (b_ih + b_hh), g-gate part pre-scaled by 2
    # wfc_ref: (1, H)      f32, fc.weight row
    # bfc_ref: (1, 1)      f32
    # out_ref: (B, 1)      f32
    TB = x_ref.shape[0]
    H = whh_ref.shape[0]
    B = out_ref.shape[0]
    T = TB // B

    # Hoisted input projection: one batched MXU pass + one bias broadcast for
    # all T timesteps (off the serial h->h critical path).
    xw = (
        jnp.dot(x_ref[...], wih_ref[...], preferred_element_type=jnp.float32)
        + b_ref[...]
    )  # (T*B, 4H)

    whh = whh_ref[...]  # load once, reused every step

    h = jnp.zeros((B, H), jnp.float32)
    c = jnp.zeros((B, H), jnp.float32)

    # Static, fully-unrolled time loop (T is a compile-time constant) ->
    # cross-iteration scheduling visibility, zero loop bookkeeping.
    for t in range(T):
        gates = xw[t * B:(t + 1) * B, :] + jnp.dot(
            h, whh, preferred_element_type=jnp.float32
        )  # (B, 4H)
        # One full-width (4H = 256 lane) sigmoid covers all four gates; the g
        # gate pre-activation was scaled by 2, so tanh(g) = 2*sigmoid(2g) - 1.
        act = jax.nn.sigmoid(gates)
        i = act[:, 0 * H:1 * H]
        f = act[:, 1 * H:2 * H]
        g = 2.0 * act[:, 2 * H:3 * H] - 1.0
        o = act[:, 3 * H:4 * H]
        c = f * c + i * g
        h = o * jnp.tanh(c)

    # Final linear layer as VPU multiply + lane reduce (avoid an N=1 MXU pass).
    out_ref[...] = jnp.sum(h * wfc_ref[...], axis=-1, keepdims=True) + bfc_ref[...]


def prepare_params(params):
    """One-time parameter prep: transposes, bias sum, g-gate pre-scaling.

    Do this ONCE per model, not per forward call.
    """
    w_ih, w_hh, b_ih, b_hh, w_fc, b_fc = (
        params["w_ih"], params["w_hh"], params["b_ih"],
        params["b_hh"], params["w_fc"], params["b_fc"],
    )
    H = w_hh.shape[1]
    # PyTorch gate order along the 4H axis is [i, f, g, o]; scale the g block
    # by 2 so tanh(g_pre) can be recovered from sigmoid(2*g_pre).
    scale = jnp.concatenate([
        jnp.ones((2 * H,), jnp.float32),
        jnp.full((H,), 2.0, jnp.float32),
        jnp.ones((H,), jnp.float32),
    ])  # (4H,)

    wih_t = (jnp.transpose(w_ih).astype(jnp.float32)) * scale[None, :]   # (D_in, 4H)
    whh_t = (jnp.transpose(w_hh).astype(jnp.float32)) * scale[None, :]   # (H, 4H)
    b = ((b_ih + b_hh).reshape(1, 4 * H).astype(jnp.float32)) * scale[None, :]
    wfc = w_fc.reshape(1, H).astype(jnp.float32)                         # (1, H)
    bfc = b_fc.reshape(1, 1).astype(jnp.float32)                         # (1, 1)
    return {"wih": wih_t, "whh": whh_t, "b": b, "wfc": wfc, "bfc": bfc}


@jax.jit
def one_step_lstm(x, prepped):
    """x: (B, T, D_in) float32; prepped: output of prepare_params. Returns (B, 1)."""
    B, T, D_in = x.shape
    # Only per-call glue: time-major flatten of the (tiny) input.
    x_tb = jnp.transpose(x, (1, 0, 2)).reshape(T * B, D_in).astype(jnp.float32)

    vmem = pl.BlockSpec(memory_space=pltpu.MemorySpace.VMEM)
    return pl.pallas_call(
        one_step_lstm_kernel,
        out_shape=jax.ShapeDtypeStruct((B, 1), jnp.float32),
        in_specs=[vmem] * 6,
        out_specs=vmem,
    )(x_tb, prepped["wih"], prepped["whh"], prepped["b"],
      prepped["wfc"], prepped["bfc"])
    # TODO(synk): if B ever grows to hundreds of rows, add a grid over B with
    # dimension_semantics=("parallel",) to use both TensorCores on v7x.


def lstm_reference(x, params):
    """Pure-JAX reference mirroring torch.nn.LSTM + Linear (exact tanh path)."""
    w_ih, w_hh, b_ih, b_hh, w_fc, b_fc = (
        params["w_ih"], params["w_hh"], params["b_ih"],
        params["b_hh"], params["w_fc"], params["b_fc"],
    )
    B, T, _ = x.shape
    H = w_hh.shape[1]
    h = jnp.zeros((B, H), jnp.float32)
    c = jnp.zeros((B, H), jnp.float32)
    for t in range(T):
        gates = x[:, t, :] @ w_ih.T + b_ih + h @ w_hh.T + b_hh
        i = jax.nn.sigmoid(gates[:, 0 * H:1 * H])
        f = jax.nn.sigmoid(gates[:, 1 * H:2 * H])
        g = jnp.tanh(gates[:, 2 * H:3 * H])
        o = jax.nn.sigmoid(gates[:, 3 * H:4 * H])
        c = f * c + i * g
        h = o * jnp.tanh(c)
    return h @ w_fc.T + b_fc


def init_params(key, input_size=5, hidden_size=64):
    """Deterministic init matching PyTorch shapes (uniform(-1/sqrt(H), 1/sqrt(H)))."""
    H = hidden_size
    k = 1.0 / jnp.sqrt(jnp.float32(H))
    keys = jax.random.split(key, 6)
    u = lambda kk, shape: jax.random.uniform(kk, shape, jnp.float32, -k, k)
    return {
        "w_ih": u(keys[0], (4 * H, input_size)),  # lstm.weight_ih_l0
        "w_hh": u(keys[1], (4 * H, H)),           # lstm.weight_hh_l0
        "b_ih": u(keys[2], (4 * H,)),             # lstm.bias_ih_l0
        "b_hh": u(keys[3], (4 * H,)),             # lstm.bias_hh_l0
        "w_fc": u(keys[4], (1, H)),               # fc.weight
        "b_fc": u(keys[5], (1,)),                 # fc.bias
    }


if __name__ == "__main__":
    key = jax.random.PRNGKey(0)
    k_params, k_x = jax.random.split(key)

    B, T, D_in, H = 2, 8, 5, 64
    params = init_params(k_params, input_size=D_in, hidden_size=H)
    x = jax.random.normal(k_x, (B, T, D_in), jnp.float32)

    prepped = prepare_params(params)          # one-time prep, outside the hot path
    y = one_step_lstm(x, prepped)
    y = jax.block_until_ready(y)

    y_ref = lstm_reference(x, params)
    assert y.shape == (B, 1)
    # tanh(x) = 2*sigmoid(2x) - 1 rewrite changes rounding slightly; 1e-4 is
    # still a meaningful f32 check for O(0.1..1) outputs.
    assert jnp.allclose(y, y_ref, atol=1e-4, rtol=1e-4), (y, y_ref)

    print("KERNEL_OK")
</pallas_src>

<mosaic_0001>
module attributes {stable_mosaic.version = 11 : i64} {
  func.func @one_step_lstm_kernel(%arg0: memref<16x5xf32, #tpu.memory_space<vmem>>, %arg1: memref<5x256xf32, #tpu.memory_space<vmem>>, %arg2: memref<64x256xf32, #tpu.memory_space<vmem>>, %arg3: memref<1x256xf32, #tpu.memory_space<vmem>>, %arg4: memref<1x64xf32, #tpu.memory_space<vmem>>, %arg5: memref<1x1xf32, #tpu.memory_space<vmem>>, %arg6: memref<2x1xf32, #tpu.memory_space<vmem>>) attributes {dimension_semantics = [], scalar_prefetch = 0 : i64, scratch_operands = 0 : i64, tpu.core_type = #tpu.core_type<tc>} {
    %c0 = arith.constant 0 : index
    %c0_0 = arith.constant 0 : index
    %0 = vector.load %arg0[%c0, %c0_0] : memref<16x5xf32, #tpu.memory_space<vmem>>, vector<16x5xf32>
    %c0_1 = arith.constant 0 : index
    %c0_2 = arith.constant 0 : index
    %1 = vector.load %arg1[%c0_1, %c0_2] : memref<5x256xf32, #tpu.memory_space<vmem>>, vector<5x256xf32>
    %cst = arith.constant dense<0.000000e+00> : vector<16x256xf32>
    %2 = tpu.matmul %0, %1, %cst {dimension_numbers = #tpu.dot_dimension_numbers<[1], [0], [0], [1], [0, 0, 1, 1], [], []>} : vector<16x5xf32>, vector<5x256xf32>, vector<16x256xf32> -> vector<16x256xf32>
    %c0_3 = arith.constant 0 : index
    %c0_4 = arith.constant 0 : index
    %3 = vector.load %arg3[%c0_3, %c0_4] : memref<1x256xf32, #tpu.memory_space<vmem>>, vector<1x256xf32>
    %4 = vector.broadcast %3 : vector<1x256xf32> to vector<16x256xf32>
    %5 = arith.addf %2, %4 : vector<16x256xf32>
    %c0_5 = arith.constant 0 : index
    %c0_6 = arith.constant 0 : index
    %6 = vector.load %arg2[%c0_5, %c0_6] : memref<64x256xf32, #tpu.memory_space<vmem>>, vector<64x256xf32>
    %cst_7 = arith.constant 0.000000e+00 : f32
    %7 = vector.broadcast %cst_7 : f32 to vector<2x64xf32>
    %cst_8 = arith.constant 0.000000e+00 : f32
    %8 = vector.broadcast %cst_8 : f32 to vector<2x64xf32>
    %9 = vector.extract_strided_slice %5 {offsets = [0, 0], sizes = [2, 256], strides = [1, 1]} : vector<16x256xf32> to vector<2x256xf32>
    %cst_9 = arith.constant dense<0.000000e+00> : vector<2x256xf32>
    %10 = tpu.matmul %7, %6, %cst_9 {dimension_numbers = #tpu.dot_dimension_numbers<[1], [0], [0], [1], [0, 0, 1, 1], [], []>} : vector<2x64xf32>, vector<64x256xf32>, vector<2x256xf32> -> vector<2x256xf32>
    %11 = arith.addf %9, %10 : vector<2x256xf32>
    %12 = arith.negf %11 : vector<2x256xf32>
    %13 = math.exp %12 : vector<2x256xf32>
    %cst_10 = arith.constant 1.000000e+00 : f32
    %14 = vector.broadcast %cst_10 : f32 to vector<2x256xf32>
    %15 = arith.addf %14, %13 : vector<2x256xf32>
    %16 = arith.divf %14, %15 : vector<2x256xf32>
    %17 = vector.extract_strided_slice %16 {offsets = [0, 0], sizes = [2, 64], strides = [1, 1]} : vector<2x256xf32> to vector<2x64xf32>
    %18 = vector.extract_strided_slice %16 {offsets = [0, 64], sizes = [2, 64], strides = [1, 1]} : vector<2x256xf32> to vector<2x64xf32>
    %19 = vector.extract_strided_slice %16 {offsets = [0, 128], sizes = [2, 64], strides = [1, 1]} : vector<2x256xf32> to vector<2x64xf32>
    %cst_11 = arith.constant 2.000000e+00 : f32
    %20 = vector.broadcast %cst_11 : f32 to vector<2x64xf32>
    %21 = arith.mulf %20, %19 : vector<2x64xf32>
    %cst_12 = arith.constant 1.000000e+00 : f32
    %22 = vector.broadcast %cst_12 : f32 to vector<2x64xf32>
    %23 = arith.subf %21, %22 : vector<2x64xf32>
    %24 = vector.extract_strided_slice %16 {offsets = [0, 192], sizes = [2, 64], strides = [1, 1]} : vector<2x256xf32> to vector<2x64xf32>
    %25 = arith.mulf %18, %8 : vector<2x64xf32>
    %26 = arith.mulf %17, %23 : vector<2x64xf32>
    %27 = arith.addf %25, %26 : vector<2x64xf32>
    %28 = math.tanh %27 : vector<2x64xf32>
    %29 = arith.mulf %24, %28 : vector<2x64xf32>
    %30 = vector.extract_strided_slice %5 {offsets = [2, 0], sizes = [2, 256], strides = [1, 1]} : vector<16x256xf32> to vector<2x256xf32>
    %cst_13 = arith.constant dense<0.000000e+00> : vector<2x256xf32>
    %31 = tpu.matmul %29, %6, %cst_13 {dimension_numbers = #tpu.dot_dimension_numbers<[1], [0], [0], [1], [0, 0, 1, 1], [], []>} : vector<2x64xf32>, vector<64x256xf32>, vector<2x256xf32> -> vector<2x256xf32>
    %32 = arith.addf %30, %31 : vector<2x256xf32>
    %33 = arith.negf %32 : vector<2x256xf32>
    %34 = math.exp %33 : vector<2x256xf32>
    %cst_14 = arith.constant 1.000000e+00 : f32
    %35 = vector.broadcast %cst_14 : f32 to vector<2x256xf32>
    %36 = arith.addf %35, %34 : vector<2x256xf32>
    %37 = arith.divf %35, %36 : vector<2x256xf32>
    %38 = vector.extract_strided_slice %37 {offsets = [0, 0], sizes = [2, 64], strides = [1, 1]} : vector<2x256xf32> to vector<2x64xf32>
    %39 = vector.extract_strided_slice %37 {offsets = [0, 64], sizes = [2, 64], strides = [1, 1]} : vector<2x256xf32> to vector<2x64xf32>
    %40 = vector.extract_strided_slice %37 {offsets = [0, 128], sizes = [2, 64], strides = [1, 1]} : vector<2x256xf32> to vector<2x64xf32>
    %cst_15 = arith.constant 2.000000e+00 : f32
    %41 = vector.broadcast %cst_15 : f32 to vector<2x64xf32>
    %42 = arith.mulf %41, %40 : vector<2x64xf32>
    %cst_16 = arith.constant 1.000000e+00 : f32
    %43 = vector.broadcast %cst_16 : f32 to vector<2x64xf32>
    %44 = arith.subf %42, %43 : vector<2x64xf32>
    %45 = vector.extract_strided_slice %37 {offsets = [0, 192], sizes = [2, 64], strides = [1, 1]} : vector<2x256xf32> to vector<2x64xf32>
    %46 = arith.mulf %39, %27 : vector<2x64xf32>
    %47 = arith.mulf %38, %44 : vector<2x64xf32>
    %48 = arith.addf %46, %47 : vector<2x64xf32>
    %49 = math.tanh %48 : vector<2x64xf32>
    %50 = arith.mulf %45, %49 : vector<2x64xf32>
    %51 = vector.extract_strided_slice %5 {offsets = [4, 0], sizes = [2, 256], strides = [1, 1]} : vector<16x256xf32> to vector<2x256xf32>
    %cst_17 = arith.constant dense<0.000000e+00> : vector<2x256xf32>
    %52 = tpu.matmul %50, %6, %cst_17 {dimension_numbers = #tpu.dot_dimension_numbers<[1], [0], [0], [1], [0, 0, 1, 1], [], []>} : vector<2x64xf32>, vector<64x256xf32>, vector<2x256xf32> -> vector<2x256xf32>
    %53 = arith.addf %51, %52 : vector<2x256xf32>
    %54 = arith.negf %53 : vector<2x256xf32>
    %55 = math.exp %54 : vector<2x256xf32>
    %cst_18 = arith.constant 1.000000e+00 : f32
    %56 = vector.broadcast %cst_18 : f32 to vector<2x256xf32>
    %57 = arith.addf %56, %55 : vector<2x256xf32>
    %58 = arith.divf %56, %57 : vector<2x256xf32>
    %59 = vector.extract_strided_slice %58 {offsets = [0, 0], sizes = [2, 64], strides = [1, 1]} : vector<2x256xf32> to vector<2x64xf32>
    %60 = vector.extract_strided_slice %58 {offsets = [0, 64], sizes = [2, 64], strides = [1, 1]} : vector<2x256xf32> to vector<2x64xf32>
    %61 = vector.extract_strided_slice %58 {offsets = [0, 128], sizes = [2, 64], strides = [1, 1]} : vector<2x256xf32> to vector<2x64xf32>
    %cst_19 = arith.constant 2.000000e+00 : f32
    %62 = vector.broadcast %cst_19 : f32 to vector<2x64xf32>
    %63 = arith.mulf %62, %61 : vector<2x64xf32>
    %cst_20 = arith.constant 1.000000e+00 : f32
    %64 = vector.broadcast %cst_20 : f32 to vector<2x64xf32>
    %65 = arith.subf %63, %64 : vector<2x64xf32>
    %66 = vector.extract_strided_slice %58 {offsets = [0, 192], sizes = [2, 64], strides = [1, 1]} : vector<2x256xf32> to vector<2x64xf32>
    %67 = arith.mulf %60, %48 : vector<2x64xf32>
    %68 = arith.mulf %59, %65 : vector<2x64xf32>
    %69 = arith.addf %67, %68 : vector<2x64xf32>
    %70 = math.tanh %69 : vector<2x64xf32>
    %71 = arith.mulf %66, %70 : vector<2x64xf32>
    %72 = vector.extract_strided_slice %5 {offsets = [6, 0], sizes = [2, 256], strides = [1, 1]} : vector<16x256xf32> to vector<2x256xf32>
    %cst_21 = arith.constant dense<0.000000e+00> : vector<2x256xf32>
    %73 = tpu.matmul %71, %6, %cst_21 {dimension_numbers = #tpu.dot_dimension_numbers<[1], [0], [0], [1], [0, 0, 1, 1], [], []>} : vector<2x64xf32>, vector<64x256xf32>, vector<2x256xf32> -> vector<2x256xf32>
    %74 = arith.addf %72, %73 : vector<2x256xf32>
    %75 = arith.negf %74 : vector<2x256xf32>
    %76 = math.exp %75 : vector<2x256xf32>
    %cst_22 = arith.constant 1.000000e+00 : f32
    %77 = vector.broadcast %cst_22 : f32 to vector<2x256xf32>
    %78 = arith.addf %77, %76 : vector<2x256xf32>
    %79 = arith.divf %77, %78 : vector<2x256xf32>
    %80 = vector.extract_strided_slice %79 {offsets = [0, 0], sizes = [2, 64], strides = [1, 1]} : vector<2x256xf32> to vector<2x64xf32>
    %81 = vector.extract_strided_slice %79 {offsets = [0, 64], sizes = [2, 64], strides = [1, 1]} : vector<2x256xf32> to vector<2x64xf32>
    %82 = vector.extract_strided_slice %79 {offsets = [0, 128], sizes = [2, 64], strides = [1, 1]} : vector<2x256xf32> to vector<2x64xf32>
    %cst_23 = arith.constant 2.000000e+00 : f32
    %83 = vector.broadcast %cst_23 : f32 to vector<2x64xf32>
    %84 = arith.mulf %83, %82 : vector<2x64xf32>
    %cst_24 = arith.constant 1.000000e+00 : f32
    %85 = vector.broadcast %cst_24 : f32 to vector<2x64xf32>
    %86 = arith.subf %84, %85 : vector<2x64xf32>
    %87 = vector.extract_strided_slice %79 {offsets = [0, 192], sizes = [2, 64], strides = [1, 1]} : vector<2x256xf32> to vector<2x64xf32>
    %88 = arith.mulf %81, %69 : vector<2x64xf32>
    %89 = arith.mulf %80, %86 : vector<2x64xf32>
    %90 = arith.addf %88, %89 : vector<2x64xf32>
    %91 = math.tanh %90 : vector<2x64xf32>
    %92 = arith.mulf %87, %91 : vector<2x64xf32>
    %93 = vector.extract_strided_slice %5 {offsets = [8, 0], sizes = [2, 256], strides = [1, 1]} : vector<16x256xf32> to vector<2x256xf32>
    %cst_25 = arith.constant dense<0.000000e+00> : vector<2x256xf32>
    %94 = tpu.matmul %92, %6, %cst_25 {dimension_numbers = #tpu.dot_dimension_numbers<[1], [0], [0], [1], [0, 0, 1, 1], [], []>} : vector<2x64xf32>, vector<64x256xf32>, vector<2x256xf32> -> vector<2x256xf32>
    %95 = arith.addf %93, %94 : vector<2x256xf32>
    %96 = arith.negf %95 : vector<2x256xf32>
    %97 = math.exp %96 : vector<2x256xf32>
    %cst_26 = arith.constant 1.000000e+00 : f32
    %98 = vector.broadcast %cst_26 : f32 to vector<2x256xf32>
    %99 = arith.addf %98, %97 : vector<2x256xf32>
    %100 = arith.divf %98, %99 : vector<2x256xf32>
    %101 = vector.extract_strided_slice %100 {offsets = [0, 0], sizes = [2, 64], strides = [1, 1]} : vector<2x256xf32> to vector<2x64xf32>
    %102 = vector.extract_strided_slice %100 {offsets = [0, 64], sizes = [2, 64], strides = [1, 1]} : vector<2x256xf32> to vector<2x64xf32>
    %103 = vector.extract_strided_slice %100 {offsets = [0, 128], sizes = [2, 64], strides = [1, 1]} : vector<2x256xf32> to vector<2x64xf32>
    %cst_27 = arith.constant 2.000000e+00 : f32
    %104 = vector.broadcast %cst_27 : f32 to vector<2x64xf32>
    %105 = arith.mulf %104, %103 : vector<2x64xf32>
    %cst_28 = arith.constant 1.000000e+00 : f32
    %106 = vector.broadcast %cst_28 : f32 to vector<2x64xf32>
    %107 = arith.subf %105, %106 : vector<2x64xf32>
    %108 = vector.extract_strided_slice %100 {offsets = [0, 192], sizes = [2, 64], strides = [1, 1]} : vector<2x256xf32> to vector<2x64xf32>
    %109 = arith.mulf %102, %90 : vector<2x64xf32>
    %110 = arith.mulf %101, %107 : vector<2x64xf32>
    %111 = arith.addf %109, %110 : vector<2x64xf32>
    %112 = math.tanh %111 : vector<2x64xf32>
    %113 = arith.mulf %108, %112 : vector<2x64xf32>
    %114 = vector.extract_strided_slice %5 {offsets = [10, 0], sizes = [2, 256], strides = [1, 1]} : vector<16x256xf32> to vector<2x256xf32>
    %cst_29 = arith.constant dense<0.000000e+00> : vector<2x256xf32>
    %115 = tpu.matmul %113, %6, %cst_29 {dimension_numbers = #tpu.dot_dimension_numbers<[1], [0], [0], [1], [0, 0, 1, 1], [], []>} : vector<2x64xf32>, vector<64x256xf32>, vector<2x256xf32> -> vector<2x256xf32>
    %116 = arith.addf %114, %115 : vector<2x256xf32>
    %117 = arith.negf %116 : vector<2x256xf32>
    %118 = math.exp %117 : vector<2x256xf32>
    %cst_30 = arith.constant 1.000000e+00 : f32
    %119 = vector.broadcast %cst_30 : f32 to vector<2x256xf32>
    %120 = arith.addf %119, %118 : vector<2x256xf32>
    %121 = arith.divf %119, %120 : vector<2x256xf32>
    %122 = vector.extract_strided_slice %121 {offsets = [0, 0], sizes = [2, 64], strides = [1, 1]} : vector<2x256xf32> to vector<2x64xf32>
    %123 = vector.extract_strided_slice %121 {offsets = [0, 64], sizes = [2, 64], strides = [1, 1]} : vector<2x256xf32> to vector<2x64xf32>
    %124 = vector.extract_strided_slice %121 {offsets = [0, 128], sizes = [2, 64], strides = [1, 1]} : vector<2x256xf32> to vector<2x64xf32>
    %cst_31 = arith.constant 2.000000e+00 : f32
    %125 = vector.broadcast %cst_31 : f32 to vector<2x64xf32>
    %126 = arith.mulf %125, %124 : vector<2x64xf32>
    %cst_32 = arith.constant 1.000000e+00 : f32
    %127 = vector.broadcast %cst_32 : f32 to vector<2x64xf32>
    %128 = arith.subf %126, %127 : vector<2x64xf32>
    %129 = vector.extract_strided_slice %121 {offsets = [0, 192], sizes = [2, 64], strides = [1, 1]} : vector<2x256xf32> to vector<2x64xf32>
    %130 = arith.mulf %123, %111 : vector<2x64xf32>
    %131 = arith.mulf %122, %128 : vector<2x64xf32>
    %132 = arith.addf %130, %131 : vector<2x64xf32>
    %133 = math.tanh %132 : vector<2x64xf32>
    %134 = arith.mulf %129, %133 : vector<2x64xf32>
    %135 = vector.extract_strided_slice %5 {offsets = [12, 0], sizes = [2, 256], strides = [1, 1]} : vector<16x256xf32> to vector<2x256xf32>
    %cst_33 = arith.constant dense<0.000000e+00> : vector<2x256xf32>
    %136 = tpu.matmul %134, %6, %cst_33 {dimension_numbers = #tpu.dot_dimension_numbers<[1], [0], [0], [1], [0, 0, 1, 1], [], []>} : vector<2x64xf32>, vector<64x256xf32>, vector<2x256xf32> -> vector<2x256xf32>
    %137 = arith.addf %135, %136 : vector<2x256xf32>
    %138 = arith.negf %137 : vector<2x256xf32>
    %139 = math.exp %138 : vector<2x256xf32>
    %cst_34 = arith.constant 1.000000e+00 : f32
    %140 = vector.broadcast %cst_34 : f32 to vector<2x256xf32>
    %141 = arith.addf %140, %139 : vector<2x256xf32>
    %142 = arith.divf %140, %141 : vector<2x256xf32>
    %143 = vector.extract_strided_slice %142 {offsets = [0, 0], sizes = [2, 64], strides = [1, 1]} : vector<2x256xf32> to vector<2x64xf32>
    %144 = vector.extract_strided_slice %142 {offsets = [0, 64], sizes = [2, 64], strides = [1, 1]} : vector<2x256xf32> to vector<2x64xf32>
    %145 = vector.extract_strided_slice %142 {offsets = [0, 128], sizes = [2, 64], strides = [1, 1]} : vector<2x256xf32> to vector<2x64xf32>
    %cst_35 = arith.constant 2.000000e+00 : f32
    %146 = vector.broadcast %cst_35 : f32 to vector<2x64xf32>
    %147 = arith.mulf %146, %145 : vector<2x64xf32>
    %cst_36 = arith.constant 1.000000e+00 : f32
    %148 = vector.broadcast %cst_36 : f32 to vector<2x64xf32>
    %149 = arith.subf %147, %148 : vector<2x64xf32>
    %150 = vector.extract_strided_slice %142 {offsets = [0, 192], sizes = [2, 64], strides = [1, 1]} : vector<2x256xf32> to vector<2x64xf32>
    %151 = arith.mulf %144, %132 : vector<2x64xf32>
    %152 = arith.mulf %143, %149 : vector<2x64xf32>
    %153 = arith.addf %151, %152 : vector<2x64xf32>
    %154 = math.tanh %153 : vector<2x64xf32>
    %155 = arith.mulf %150, %154 : vector<2x64xf32>
    %156 = vector.extract_strided_slice %5 {offsets = [14, 0], sizes = [2, 256], strides = [1, 1]} : vector<16x256xf32> to vector<2x256xf32>
    %cst_37 = arith.constant dense<0.000000e+00> : vector<2x256xf32>
    %157 = tpu.matmul %155, %6, %cst_37 {dimension_numbers = #tpu.dot_dimension_numbers<[1], [0], [0], [1], [0, 0, 1, 1], [], []>} : vector<2x64xf32>, vector<64x256xf32>, vector<2x256xf32> -> vector<2x256xf32>
    %158 = arith.addf %156, %157 : vector<2x256xf32>
    %159 = arith.negf %158 : vector<2x256xf32>
    %160 = math.exp %159 : vector<2x256xf32>
    %cst_38 = arith.constant 1.000000e+00 : f32
    %161 = vector.broadcast %cst_38 : f32 to vector<2x256xf32>
    %162 = arith.addf %161, %160 : vector<2x256xf32>
    %163 = arith.divf %161, %162 : vector<2x256xf32>
    %164 = vector.extract_strided_slice %163 {offsets = [0, 0], sizes = [2, 64], strides = [1, 1]} : vector<2x256xf32> to vector<2x64xf32>
    %165 = vector.extract_strided_slice %163 {offsets = [0, 64], sizes = [2, 64], strides = [1, 1]} : vector<2x256xf32> to vector<2x64xf32>
    %166 = vector.extract_strided_slice %163 {offsets = [0, 128], sizes = [2, 64], strides = [1, 1]} : vector<2x256xf32> to vector<2x64xf32>
    %cst_39 = arith.constant 2.000000e+00 : f32
    %167 = vector.broadcast %cst_39 : f32 to vector<2x64xf32>
    %168 = arith.mulf %167, %166 : vector<2x64xf32>
    %cst_40 = arith.constant 1.000000e+00 : f32
    %169 = vector.broadcast %cst_40 : f32 to vector<2x64xf32>
    %170 = arith.subf %168, %169 : vector<2x64xf32>
    %171 = vector.extract_strided_slice %163 {offsets = [0, 192], sizes = [2, 64], strides = [1, 1]} : vector<2x256xf32> to vector<2x64xf32>
    %172 = arith.mulf %165, %153 : vector<2x64xf32>
    %173 = arith.mulf %164, %170 : vector<2x64xf32>
    %174 = arith.addf %172, %173 : vector<2x64xf32>
    %175 = math.tanh %174 : vector<2x64xf32>
    %176 = arith.mulf %171, %175 : vector<2x64xf32>
    %c0_41 = arith.constant 0 : index
    %c0_42 = arith.constant 0 : index
    %177 = vector.load %arg4[%c0_41, %c0_42] : memref<1x64xf32, #tpu.memory_space<vmem>>, vector<1x64xf32>
    %178 = vector.broadcast %177 : vector<1x64xf32> to vector<2x64xf32>
    %179 = arith.mulf %176, %178 : vector<2x64xf32>
    %cst_43 = arith.constant dense<0.000000e+00> : vector<2xf32>
    %180 = vector.multi_reduction <add>, %179, %cst_43 [1] : vector<2x64xf32> to vector<2xf32>
    %181 = vector.shape_cast %180 : vector<2xf32> to vector<2x1xf32>
    %c0_44 = arith.constant 0 : index
    %c0_45 = arith.constant 0 : index
    %182 = vector.load %arg5[%c0_44, %c0_45] : memref<1x1xf32, #tpu.memory_space<vmem>>, vector<1x1xf32>
    %183 = vector.broadcast %182 : vector<1x1xf32> to vector<2x1xf32>
    %184 = arith.addf %181, %183 : vector<2x1xf32>
    %c0_46 = arith.constant 0 : index
    %c0_47 = arith.constant 0 : index
    %185 = vector.load %arg6[%c0_46, %c0_47] : memref<2x1xf32, #tpu.memory_space<vmem>>, vector<2x1xf32>
    tpu.vector_store %arg6[%c0_46, %c0_47], %184 {strides = array<i32>} : memref<2x1xf32, #tpu.memory_space<vmem>>, vector<2x1xf32>,
    return
  }
}

</mosaic_0001>

<bundles_post_ra>
// kernel: one_step_lstm.1
= control target key start
LH: loop header
LB: loop body
LE: loop exit
PB: predicated region body
PF: predicated region fallthrough
CT: control target
= control target key end

     0   :  { %s1510_s0 = inlined_call_operand.vmem [shape: f32[16,5], index: 0, kind: input, shape index: {}]   ;;  %s1511_s1 = inlined_call_operand.vmem [shape: f32[5,256], index: 1, kind: input, shape index: {}]   ;;  %s1512_s2 = inlined_call_operand.hbm [shape: f32[64,256], index: 2, kind: input, shape index: {}]   ;;  %s1513_s3 = inlined_call_operand.vmem [shape: f32[1,256], index: 3, kind: input, shape index: {}]   ;;  %s1514_s4 = inlined_call_operand.vmem [shape: f32[1,64], index: 4, kind: input, shape index: {}]   ;;  %s1515_s5 = inlined_call_operand.<no memory space> [shape: f32[1,1], index: 5, kind: input, shape index: {}]   ;;  %s1516_s6 = inlined_call_operand.vmem [shape: f32[2,1], index: 6, kind: output, shape index: {}]  }
   0x1   :  { %v11_v0 = vstv %s1515_s5 }
   0x2   :  { %12 = vst [vmem:[#allocation2] sm:$0x1] %v11_v0 }
   0x3   :  { %13 = vsyncpa [#allocation4], 0  ;;  %s1208_s23 = smov [#allocation3]  }
   0x4   :  { %s23_s24 = sshll.u32 %s1208_s23, 4  ;;  %s24_s24 = int_to_ptr.vmem [resolvable:$true] %s23_s24 }
   0x5   :  { %s1194_s25 = scalar_lea.vmem %s24_s24, 2048  ;;  %p1199_p1 = scmp.lt.s32.totalorder %s24_s24, %s24_s24 }
   0x6   :  { %p1195_p0 = scmp.ne.s32.totalorder %s24_s24, %s1194_s25  ;;  %p1200_p2 = scmp.lt.s32.totalorder %s1194_s25, %s1194_s25 }
   0x8   :  { %p1201_p3 = por %p1200_p2, %p1199_p1 }
   0xa   :  { %p1202_p4 = pnand %p1201_p3, %p1195_p0 }
   0xc   :  { %1205 = shalt.err (!%p1202_p4)
}
   0xd   :  { %s1209_s26 = smov 256   ;;  %s1210_s27 = smov 16  }
   0xe   :  { %29 = dma.hbm_to_vmem [thread:$0]  %s1512_s2, 2048, %s24_s24, [#allocation4], %s1209_s26, %s1209_s26, %s1210_s27  }
   0xf   :  { %1206 = dma.done.wait [#allocation4], 2048  }
  0x10   :  { %1207 = vsyncadd [#allocation4], 4294965248  ;;  %v1211_v1 = vmov 0.0   ;;  %v1256_v2 = vld [vmem:[#allocation3 + $0x78] sm:$0xff]  ;;  %v1258_v3 = vld [vmem:[#allocation3 + $0x70] sm:$0xff]  ;;  %vm62_vm0 = vcmask 1044480   ;;  %v45_v21 = vlaneseq }
  0x11   :  { %133 = vmatprep.mubr.f32.mxu0 %v1211_v1  ;;  %230 = vmatprep.mubr.f32.mxu1 %v1211_v1  ;;  %v1260_v4 = vld [vmem:[#allocation3 + $0x68] sm:$0xff]  ;;  %v1263_v5 = vld [vmem:[#allocation3 + $0x60] sm:$0xff]  ;;  %v1266_v6 = vld [vmem:[#allocation3 + $0x58] sm:$0xff]  ;;  %vm55_vm1 = vcmask 39936   ;;  %vm162_vm2 = vcmask 523264   ;;  %vm1045_vm3 = vcmask 523270  }
  0x12   :  { %182 = vmatprep.subr.mxu1 %v1256_v2  ;;  %v1269_v7 = vld [vmem:[#allocation3 + $0x50] sm:$0xff]  ;;  %v42_v8 = vld [vmem:[%s1511_s1 + $0x8] sm:$0x1f]  ;;  %v41_v10 = vld [vmem:[%s1511_s1] sm:$0x1f]  ;;  %v46_v22 = vshrl.u32 %v45_v21, 7 }
  0x13   :  { %183 = vmatpush1.msra.mxu1 %v1258_v3  ;;  %v1275_v9 = vld [vmem:[#allocation3 + $0x48] sm:$0xff]  ;;  %1064 = vmatprep.subr.msk.mxu0 %vm62_vm0, %v42_v8  ;;  %v39_v11 = vld [vmem:[%s1510_s0] sm:$0xff]  ;;  %v1291_v14 = vld [vmem:[#allocation3 + $0x30] sm:$0xff]  ;;  %vm1057_vm4 = vcmask 7174  }
  0x14   :  { %184 = vmatprep.subr.mxu1 %v1260_v4  ;;  %v1284_v12 = vld [vmem:[#allocation3 + $0x40] sm:$0xff]  ;;  %1065 = vmatpush1.msk.msra.mxu0 %vm62_vm0, %v41_v10  ;;  %v1287_v13 = vld [vmem:[#allocation3 + $0x38] sm:$0xff]  ;;  %v1295_v15 = vld [vmem:[#allocation3 + $0x28] sm:$0xff]  ;;  %v47_v23 = vsub.s32 0, %v46_v22  ;;  %v51_v26 = vsub.s32 1, %v46_v22 }
  0x15   :  { %185 = vmatpush1.msra.mxu1 %v1263_v5  ;;  %1066 = vmatmul.mubr.msk.f32.vlgmr.msra.gmra.mxu0 %vm55_vm1, %v39_v11  ;;  %v1299_v16 = vld [vmem:[#allocation3 + $0x20] sm:$0xff]  ;;  %v1303_v17 = vld [vmem:[#allocation3 + $0x18] sm:$0xff]  ;;  %v1307_v18 = vld [vmem:[#allocation3 + $0x10] sm:$0xff] }
  0x16   :  { %186 = vmatprep.subr.mxu1 %v1266_v6  ;;  %283 = vmatprep.subr.mxu0 %v1256_v2  ;;  %v1311_v19 = vld [vmem:[#allocation3 + $0x8] sm:$0xff]  ;;  %v1315_v20 = vld [vmem:[#allocation3] sm:$0xff] }
  0x17   :  { %187 = vmatpush1.msra.mxu1 %v1269_v7  ;;  %284 = vmatpush1.msra.mxu0 %v1258_v3  ;;  %v43_v24 = vld [vmem:[%s1513_s3] sm:$0x3]  ;;  %s1212_s3 = smov 64   ;;  %v40_v47 = vld [vmem:[%s1510_s0 + $0x8] sm:$0xff] }
  0x18   :  { %188 = vmatprep.subr.mxu1 %v1275_v9  ;;  %285 = vmatprep.subr.mxu0 %v1260_v4  ;;  %v1354_v25 = vrot.slane %v43_v24, %v47_v23  ;;  %v1359_v29 = vrot.slane %v43_v24, %v51_v26 }
  0x19   :  { %189 = vmatpush1.msra.mxu1 %v1284_v12  ;;  %286 = vmatpush1.msra.mxu0 %v1263_v5 }
  0x1a   :  { %190 = vmatprep.subr.mxu1 %v1287_v13  ;;  %287 = vmatprep.subr.mxu0 %v1266_v6 }
  0x1b   :  { %191 = vmatpush1.msra.mxu1 %v1291_v14  ;;  %288 = vmatpush1.msra.mxu0 %v1269_v7 }
  0x1c   :  { %192 = vmatprep.subr.mxu1 %v1295_v15  ;;  %289 = vmatprep.subr.mxu0 %v1275_v9 }
  0x1d   :  { %193 = vmatpush1.msra.mxu1 %v1299_v16  ;;  %290 = vmatpush1.msra.mxu0 %v1284_v12 }
  0x1e   :  { %194 = vmatprep.subr.mxu1 %v1303_v17  ;;  %291 = vmatprep.subr.mxu0 %v1287_v13 }
  0x1f   :  { %195 = vmatpush1.msra.mxu1 %v1307_v18  ;;  %139 = vmatprep.mubr.f32.mxu0 %v1211_v1 }
  0x20   :  { %196 = vmatprep.subr.mxu1 %v1311_v19  ;;  %292 = vmatpush1.msra.mxu0 %v1291_v14 }
  0x21   :  { %197 = vmatpush1.msra.mxu1 %v1315_v20  ;;  %293 = vmatprep.subr.mxu0 %v1295_v15 }
  0x22   :  { %231 = vmatmul.mubr.f32.vlgmr.msra.gmra.mxu1 %v1211_v1  ;;  %394 = vmatprep.subr.mxu1 %v1256_v2 }
  0x23   :  { %294 = vmatpush1.msra.mxu0 %v1299_v16  ;;  %395 = vmatpush1.msra.mxu1 %v1258_v3 }
  0x24   :  { %295 = vmatprep.subr.mxu0 %v1303_v17  ;;  %396 = vmatprep.subr.mxu1 %v1260_v4 }
  0x25   :  { %296 = vmatpush1.msra.mxu0 %v1307_v18  ;;  %397 = vmatpush1.msra.mxu1 %v1263_v5 }
  0x26   :  { %297 = vmatprep.subr.mxu0 %v1311_v19  ;;  %398 = vmatprep.subr.mxu1 %v1266_v6 }
  0x27   :  { %298 = vmatpush1.msra.mxu0 %v1315_v20  ;;  %399 = vmatpush1.msra.mxu1 %v1269_v7 }
  0x28   :  { %400 = vmatprep.subr.mxu1 %v1275_v9  ;;  %442 = vmatprep.mubr.f32.mxu1 %v1211_v1 }
  0x29   :  { %401 = vmatpush1.msra.mxu1 %v1284_v12  ;;  %505 = vmatprep.subr.mxu0 %v1256_v2 }
  0x2a   :  { %402 = vmatprep.subr.mxu1 %v1287_v13  ;;  %1067 = vmatmul.mubr.msk.f32.gmra.mxu0 %vm55_vm1, %v40_v47 }
  0x2b   :  { %403 = vmatpush1.msra.mxu1 %v1291_v14  ;;  %331 = vmatprep.mubr.f32.mxu0 %v1211_v1 }
  0x2c   :  { %404 = vmatprep.subr.mxu1 %v1295_v15 }
  0x2d   :  { %405 = vmatpush1.msra.mxu1 %v1299_v16 }
  0x2e   :  { %406 = vmatprep.subr.mxu1 %v1303_v17 }
  0x2f   :  { %407 = vmatpush1.msra.mxu1 %v1307_v18 }
  0x30   :  { %408 = vmatprep.subr.mxu1 %v1311_v19 }
  0x31   :  { %409 = vmatpush1.msra.mxu1 %v1315_v20 }
  0x32   :  { %616 = vmatprep.subr.mxu1 %v1256_v2 }
  0xd5   :  { %v135_v27 = vpop.f32.mrf.mxu0 }
  0xd6   :  { %v1357_v28 = vadd.f32 %v135_v27, %v1354_v25 }
  0xd7   :  { %v137_v30 = vpop.f32.mrf.mxu0 }
  0xd8   :  { %v1362_v32 = vadd.f32 %v137_v30, %v1359_v29 }
  0xe2   :  { %v232_v31 = vpop.f32.mrf.mxu1 }
  0xe3   :  { %v237_v33 = vadd.f32 %v232_v31, %v1357_v28 }
  0xe4   :  { %v234_v34 = vpop.f32.mrf.mxu1 }
  0xe5   :  { %v1068_v35 = vmul.f32 -1.442695, %v237_v33  ;;  %v238_v36 = vadd.f32 %v234_v34, %v1362_v32 }
  0xe7   :  { %v1069_v37 = vmul.f32 -1.442695, %v238_v36  ;;  %1106 = vpow2.f32 %v1068_v35 }
  0xe9   :  { %1108 = vpow2.f32 %v1069_v37 }
  0xea   :  { %v1391_v54 = vpop.f32.mrf.mxu0 }
  0xec   :  { %v1393_v55 = vpop.f32.mrf.mxu0 }
  0xf4   :  { %v1107_v38 = vpop.eup %1106 }
  0xf5   :  { %v245_v41 = vadd.f32 1.0, %v1107_v38 }
  0xf6   :  { %v1109_v39 = vpop.eup %1108 }
  0xf7   :  { %v246_v40 = vadd.f32 1.0, %v1109_v39 }
  0xf9   :  { %1110 = vrcp.f32 %v246_v40 }
  0xfa   :  { %1112 = vrcp.f32 %v245_v41 }
 0x106   :  { %v1111_v42 = vpop.eup %1110 }
 0x107   :  { %v251_v43 = vmul.f32 2.0, %v1111_v42  ;;  %v1113_v45 = vpop.eup %1112 }
 0x108   :  { %v253_v48 = vmul.f32 0.0, %v1113_v45 }
 0x109   :  { %v1070_v44 = vadd.f32 -1.0, %v251_v43 }
 0x10b   :  { %v254_v46 = vmul.f32 %v1113_v45, %v1070_v44 }
 0x10d   :  { %256 = vrot.lane.b32.xlu0 %v254_v46, %s1212_s3 }
 0x17f   :  { %v257_v49 = vpop.permute.xlu0 %256 }
 0x180   :  { %v259_v50 = vadd.f32 %v257_v49, %v253_v48 }
 0x182   :  { %1114 = vtanh.f32 %v259_v50  ;;  %v361_v21 = vrot.slane %v259_v50, 6 }
 0x18f   :  { %v1115_v51 = vpop.eup %1114 }
 0x190   :  { %v261_v52 = vmul.f32 %v1115_v51, %v1111_v42 }
 0x192   :  { %263 = vrot.lane.b32.xlu0 %v261_v52, %s1212_s3 }
 0x204   :  { %v264_v53 = vpop.permute.xlu0 %263 }
 0x205   :  { %1071 = vmatmul.mubr.msk.f32.vlgmr.msra.gmra.mxu0 %vm162_vm2, %v264_v53 }
 0x206   :  { %506 = vmatpush1.msra.mxu0 %v1258_v3  ;;  %553 = vmatprep.mubr.f32.mxu0 %v1211_v1 }
 0x207   :  { %507 = vmatprep.subr.mxu0 %v1260_v4 }
 0x208   :  { %508 = vmatpush1.msra.mxu0 %v1263_v5 }
 0x209   :  { %509 = vmatprep.subr.mxu0 %v1266_v6 }
 0x20a   :  { %510 = vmatpush1.msra.mxu0 %v1269_v7 }
 0x20b   :  { %511 = vmatprep.subr.mxu0 %v1275_v9 }
 0x20c   :  { %512 = vmatpush1.msra.mxu0 %v1284_v12 }
 0x20d   :  { %513 = vmatprep.subr.mxu0 %v1287_v13 }
 0x20e   :  { %514 = vmatpush1.msra.mxu0 %v1291_v14 }
 0x20f   :  { %515 = vmatprep.subr.mxu0 %v1295_v15 }
 0x210   :  { %516 = vmatpush1.msra.mxu0 %v1299_v16 }
 0x211   :  { %517 = vmatprep.subr.mxu0 %v1303_v17 }
 0x212   :  { %518 = vmatpush1.msra.mxu0 %v1307_v18 }
 0x213   :  { %519 = vmatprep.subr.mxu0 %v1311_v19 }
 0x214   :  { %520 = vmatpush1.msra.mxu0 %v1315_v20 }
 0x215   :  { %720 = vmatprep.subr.mxu0 %v1256_v2 }
 0x2c5   :  { %v333_v56 = vpop.f32.mrf.mxu0 }
 0x2c6   :  { %v340_v57 = vrot.slane %v333_v56, 6 }
 0x2c7   :  { %v335_v58 = vpop.f32.mrf.mxu0 }
 0x2c8   :  { %v344_v59 = vadd.f32 %v340_v57, %v1357_v28  ;;  %v341_v60 = vrot.slane %v335_v58, 6 }
 0x2ca   :  { %v1072_v61 = vmul.f32 -1.442695, %v344_v59  ;;  %v345_v62 = vadd.f32 %v341_v60, %v1362_v32 }
 0x2cc   :  { %1116 = vpow2.f32 %v1072_v61  ;;  %v1073_v63 = vmul.f32 -1.442695, %v345_v62 }
 0x2ce   :  { %1118 = vpow2.f32 %v1073_v63 }
 0x2d9   :  { %v1117_v0 = vpop.eup %1116 }
 0x2da   :  { %v352_v8 = vadd.f32 1.0, %v1117_v0 }
 0x2db   :  { %v1119_v10 = vpop.eup %1118 }
 0x2dc   :  { %1120 = vrcp.f32 %v352_v8  ;;  %v353_v11 = vadd.f32 1.0, %v1119_v10 }
 0x2de   :  { %1122 = vrcp.f32 %v353_v11 }
 0x2e9   :  { %v1121_v22 = vpop.eup %1120 }
 0x2ea   :  { %v363_v23 = vmul.f32 %v1121_v22, %v361_v21 }
 0x2eb   :  { %v1123_v24 = vpop.eup %1122 }
 0x2ec   :  { %v358_v26 = vmul.f32 2.0, %v1123_v24 }
 0x2ee   :  { %v1074_v27 = vadd.f32 -1.0, %v358_v26 }
 0x2f0   :  { %v364_v30 = vmul.f32 %v1121_v22, %v1074_v27 }
 0x2f2   :  { %366 = vrot.lane.b32.xlu1 %v364_v30, %s1212_s3 }
 0x364   :  { %v367_v31 = vpop.permute.xlu1 %366 }
 0x365   :  { %v369_v33 = vadd.f32 %v367_v31, %v363_v23 }
 0x367   :  { %1124 = vtanh.f32 %v369_v33  ;;  %v472_v50 = vrot.slane %v369_v33, 6 }
 0x374   :  { %v1125_v34 = vpop.eup %1124 }
 0x375   :  { %v371_v35 = vmul.f32 %v1125_v34, %v1123_v24 }
 0x377   :  { %v373_v36 = vrot.slane %v371_v35, 2 }
 0x379   :  { %374 = vrot.lane.b32.xlu1 %v373_v36, %s1212_s3 }
 0x3eb   :  { %v375_v37 = vpop.permute.xlu1 %374 }
 0x3ec   :  { %1075 = vmatmul.mubr.msk.f32.vlgmr.msra.gmra.mxu1 %vm162_vm2, %v375_v37 }
 0x3ed   :  { %617 = vmatpush1.msra.mxu1 %v1258_v3  ;;  %664 = vmatprep.mubr.f32.mxu1 %v1211_v1 }
 0x3ee   :  { %618 = vmatprep.subr.mxu1 %v1260_v4 }
 0x3ef   :  { %619 = vmatpush1.msra.mxu1 %v1263_v5 }
 0x3f0   :  { %620 = vmatprep.subr.mxu1 %v1266_v6 }
 0x3f1   :  { %621 = vmatpush1.msra.mxu1 %v1269_v7 }
 0x3f2   :  { %622 = vmatprep.subr.mxu1 %v1275_v9 }
 0x3f3   :  { %623 = vmatpush1.msra.mxu1 %v1284_v12 }
 0x3f4   :  { %624 = vmatprep.subr.mxu1 %v1287_v13 }
 0x3f5   :  { %625 = vmatpush1.msra.mxu1 %v1291_v14 }
 0x3f6   :  { %626 = vmatprep.subr.mxu1 %v1295_v15 }
 0x3f7   :  { %627 = vmatpush1.msra.mxu1 %v1299_v16 }
 0x3f8   :  { %628 = vmatprep.subr.mxu1 %v1303_v17 }
 0x3f9   :  { %629 = vmatpush1.msra.mxu1 %v1307_v18 }
 0x3fa   :  { %630 = vmatprep.subr.mxu1 %v1311_v19 }
 0x3fb   :  { %631 = vmatpush1.msra.mxu1 %v1315_v20 }
 0x3fc   :  { %831 = vmatprep.subr.mxu1 %v1256_v2 }
 0x4ac   :  { %v444_v38 = vpop.f32.mrf.mxu1 }
 0x4ad   :  { %v451_v39 = vrot.slane %v444_v38, 4 }
 0x4ae   :  { %v446_v40 = vpop.f32.mrf.mxu1 }
 0x4af   :  { %v455_v41 = vadd.f32 %v451_v39, %v1357_v28  ;;  %v452_v42 = vrot.slane %v446_v40, 4 }
 0x4b1   :  { %v1076_v43 = vmul.f32 -1.442695, %v455_v41  ;;  %v456_v44 = vadd.f32 %v452_v42, %v1362_v32 }
 0x4b3   :  { %1126 = vpow2.f32 %v1076_v43  ;;  %v1077_v45 = vmul.f32 -1.442695, %v456_v44  ;;  %v1462_v44 = vadd.f32 %v1391_v54, %v1354_v25 }
 0x4b5   :  { %1128 = vpow2.f32 %v1077_v45 }
 0x4c0   :  { %v1127_v46 = vpop.eup %1126 }
 0x4c1   :  { %v463_v47 = vadd.f32 1.0, %v1127_v46  ;;  %v1466_v46 = vadd.f32 %v1393_v55, %v1359_v29 }
 0x4c2   :  { %v1129_v48 = vpop.eup %1128 }
 0x4c3   :  { %1130 = vrcp.f32 %v463_v47  ;;  %v464_v49 = vadd.f32 1.0, %v1129_v48 }
 0x4c5   :  { %1132 = vrcp.f32 %v464_v49 }
 0x4d0   :  { %v1131_v51 = vpop.eup %1130 }
 0x4d1   :  { %v474_v52 = vmul.f32 %v1131_v51, %v472_v50 }
 0x4d2   :  { %v1133_v53 = vpop.eup %1132 }
 0x4d3   :  { %v469_v56 = vmul.f32 2.0, %v1133_v53 }
 0x4d5   :  { %v1078_v57 = vadd.f32 -1.0, %v469_v56 }
 0x4d7   :  { %v475_v58 = vmul.f32 %v1131_v51, %v1078_v57 }
 0x4d9   :  { %477 = vrot.lane.b32.xlu0 %v475_v58, %s1212_s3 }
 0x54b   :  { %v478_v59 = vpop.permute.xlu0 %477 }
 0x54c   :  { %v480_v60 = vadd.f32 %v478_v59, %v474_v52 }
 0x54e   :  { %1134 = vtanh.f32 %v480_v60  ;;  %v583_v34 = vrot.slane %v480_v60, 6 }
 0x55b   :  { %v1135_v61 = vpop.eup %1134 }
 0x55c   :  { %v482_v62 = vmul.f32 %v1135_v61, %v1133_v53 }
 0x55e   :  { %v484_v63 = vrot.slane %v482_v62, 4 }
 0x560   :  { %485 = vrot.lane.b32.xlu1 %v484_v63, %s1212_s3 }
 0x5d2   :  { %v486_v0 = vpop.permute.xlu1 %485 }
 0x5d3   :  { %1079 = vmatmul.mubr.msk.f32.vlgmr.msra.gmra.mxu0 %vm162_vm2, %v486_v0 }
 0x5d4   :  { %721 = vmatpush1.msra.mxu0 %v1258_v3  ;;  %768 = vmatprep.mubr.f32.mxu0 %v1211_v1 }
 0x5d5   :  { %722 = vmatprep.subr.mxu0 %v1260_v4 }
 0x5d6   :  { %723 = vmatpush1.msra.mxu0 %v1263_v5 }
 0x5d7   :  { %724 = vmatprep.subr.mxu0 %v1266_v6 }
 0x5d8   :  { %725 = vmatpush1.msra.mxu0 %v1269_v7 }
 0x5d9   :  { %726 = vmatprep.subr.mxu0 %v1275_v9 }
 0x5da   :  { %727 = vmatpush1.msra.mxu0 %v1284_v12 }
 0x5db   :  { %728 = vmatprep.subr.mxu0 %v1287_v13 }
 0x5dc   :  { %729 = vmatpush1.msra.mxu0 %v1291_v14 }
 0x5dd   :  { %730 = vmatprep.subr.mxu0 %v1295_v15 }
 0x5de   :  { %731 = vmatpush1.msra.mxu0 %v1299_v16 }
 0x5df   :  { %732 = vmatprep.subr.mxu0 %v1303_v17 }
 0x5e0   :  { %733 = vmatpush1.msra.mxu0 %v1307_v18 }
 0x5e1   :  { %734 = vmatprep.subr.mxu0 %v1311_v19 }
 0x5e2   :  { %735 = vmatpush1.msra.mxu0 %v1315_v20 }
 0x5e3   :  { %942 = vmatprep.subr.mxu0 %v1256_v2 }
 0x693   :  { %v555_v8 = vpop.f32.mrf.mxu0 }
 0x694   :  { %v562_v10 = vrot.slane %v555_v8, 2 }
 0x695   :  { %v557_v11 = vpop.f32.mrf.mxu0 }
 0x696   :  { %v566_v21 = vadd.f32 %v562_v10, %v1357_v28  ;;  %v563_v22 = vrot.slane %v557_v11, 2 }
 0x698   :  { %v1080_v23 = vmul.f32 -1.442695, %v566_v21  ;;  %v567_v24 = vadd.f32 %v563_v22, %v1362_v32 }
 0x69a   :  { %1136 = vpow2.f32 %v1080_v23  ;;  %v1081_v26 = vmul.f32 -1.442695, %v567_v24 }
 0x69c   :  { %1138 = vpow2.f32 %v1081_v26 }
 0x6a7   :  { %v1137_v27 = vpop.eup %1136 }
 0x6a8   :  { %v574_v30 = vadd.f32 1.0, %v1137_v27 }
 0x6a9   :  { %v1139_v31 = vpop.eup %1138 }
 0x6aa   :  { %1140 = vrcp.f32 %v574_v30  ;;  %v575_v33 = vadd.f32 1.0, %v1139_v31 }
 0x6ac   :  { %1142 = vrcp.f32 %v575_v33 }
 0x6b7   :  { %v1141_v2 = vpop.eup %1140 }
 0x6b8   :  { %v585_v35 = vmul.f32 %v1141_v2, %v583_v34 }
 0x6b9   :  { %v1143_v36 = vpop.eup %1142 }
 0x6ba   :  { %v580_v37 = vmul.f32 2.0, %v1143_v36 }
 0x6bc   :  { %v1082_v38 = vadd.f32 -1.0, %v580_v37 }
 0x6be   :  { %v586_v28 = vmul.f32 %v1141_v2, %v1082_v38 }
 0x6c0   :  { %588 = vrot.lane.b32.xlu0 %v586_v28, %s1212_s3 }
 0x732   :  { %v589_v39 = vpop.permute.xlu0 %588 }
 0x733   :  { %v591_v32 = vadd.f32 %v589_v39, %v585_v35 }
 0x735   :  { %1144 = vtanh.f32 %v591_v32  ;;  %v688_v54 = vrot.slane %v591_v32, 6 }
 0x742   :  { %v1145_v40 = vpop.eup %1144 }
 0x743   :  { %v593_v41 = vmul.f32 %v1145_v40, %v1143_v36 }
 0x745   :  { %v595_v42 = vrot.slane %v593_v41, 6 }
 0x747   :  { %596 = vrot.lane.b32.xlu1 %v595_v42, %s1212_s3 }
 0x7b9   :  { %v597_v43 = vpop.permute.xlu1 %596 }
 0x7ba   :  { %1083 = vmatmul.mubr.msk.f32.vlgmr.msra.gmra.mxu1 %vm162_vm2, %v597_v43 }
 0x7bb   :  { %832 = vmatpush1.msra.mxu1 %v1258_v3  ;;  %879 = vmatprep.mubr.f32.mxu1 %v1211_v1 }
 0x7bc   :  { %833 = vmatprep.subr.mxu1 %v1260_v4 }
 0x7bd   :  { %834 = vmatpush1.msra.mxu1 %v1263_v5 }
 0x7be   :  { %835 = vmatprep.subr.mxu1 %v1266_v6 }
 0x7bf   :  { %836 = vmatpush1.msra.mxu1 %v1269_v7 }
 0x7c0   :  { %837 = vmatprep.subr.mxu1 %v1275_v9 }
 0x7c1   :  { %838 = vmatpush1.msra.mxu1 %v1284_v12 }
 0x7c2   :  { %839 = vmatprep.subr.mxu1 %v1287_v13 }
 0x7c3   :  { %840 = vmatpush1.msra.mxu1 %v1291_v14 }
 0x7c4   :  { %841 = vmatprep.subr.mxu1 %v1295_v15 }
 0x7c5   :  { %842 = vmatpush1.msra.mxu1 %v1299_v16 }
 0x7c6   :  { %843 = vmatprep.subr.mxu1 %v1303_v17 }
 0x7c7   :  { %844 = vmatpush1.msra.mxu1 %v1307_v18 }
 0x7c8   :  { %845 = vmatprep.subr.mxu1 %v1311_v19 }
 0x7c9   :  { %846 = vmatpush1.msra.mxu1 %v1315_v20 }
 0x87a   :  { %v666_v45 = vpop.f32.mrf.mxu1 }
 0x87b   :  { %v671_v47 = vadd.f32 %v666_v45, %v1462_v44 }
 0x87c   :  { %v668_v48 = vpop.f32.mrf.mxu1 }
 0x87d   :  { %v1084_v49 = vmul.f32 -1.442695, %v671_v47  ;;  %v672_v50 = vadd.f32 %v668_v48, %v1466_v46 }
 0x87f   :  { %1146 = vpow2.f32 %v1084_v49  ;;  %v1085_v51 = vmul.f32 -1.442695, %v672_v50 }
 0x881   :  { %1148 = vpow2.f32 %v1085_v51 }
 0x88c   :  { %v1147_v52 = vpop.eup %1146 }
 0x88d   :  { %v679_v53 = vadd.f32 1.0, %v1147_v52 }
 0x88e   :  { %v1149_v56 = vpop.eup %1148 }
 0x88f   :  { %1150 = vrcp.f32 %v679_v53  ;;  %v680_v25 = vadd.f32 1.0, %v1149_v56 }
 0x891   :  { %1152 = vrcp.f32 %v680_v25 }
 0x89c   :  { %v1151_v57 = vpop.eup %1150 }
 0x89d   :  { %v690_v58 = vmul.f32 %v1151_v57, %v688_v54  ;;  %v1099_v54 = vld [vmem:[%s1514_s4] ss:$0 sm:$0xff] }
 0x89e   :  { %v1153_v29 = vpop.eup %1152 }
 0x89f   :  { %v685_v55 = vmul.f32 2.0, %v1153_v29 }
 0x8a1   :  { %v1086_v59 = vadd.f32 -1.0, %v685_v55 }
 0x8a3   :  { %v691_v60 = vmul.f32 %v1151_v57, %v1086_v59 }
 0x8a5   :  { %693 = vrot.lane.b32.xlu0 %v691_v60, %s1212_s3 }
 0x917   :  { %v694_v61 = vpop.permute.xlu0 %693 }
 0x918   :  { %v696_v62 = vadd.f32 %v694_v61, %v690_v58 }
 0x91a   :  { %1154 = vtanh.f32 %v696_v62 }
 0x927   :  { %v1155_v63 = vpop.eup %1154 }
 0x928   :  { %v698_v0 = vmul.f32 %v1155_v63, %v1153_v29 }
 0x92a   :  { %700 = vrot.lane.b32.xlu1 %v698_v0, %s1212_s3 }
 0x99c   :  { %v701_v8 = vpop.permute.xlu1 %700 }
 0x99d   :  { %1087 = vmatmul.mubr.msk.f32.vlgmr.msra.gmra.mxu0 %vm162_vm2, %v701_v8 }
 0x99e   :  { %943 = vmatpush1.msra.mxu0 %v1258_v3  ;;  %990 = vmatprep.mubr.f32.mxu0 %v1211_v1 }
 0x99f   :  { %944 = vmatprep.subr.mxu0 %v1260_v4 }
 0x9a0   :  { %945 = vmatpush1.msra.mxu0 %v1263_v5 }
 0x9a1   :  { %946 = vmatprep.subr.mxu0 %v1266_v6 }
 0x9a2   :  { %947 = vmatpush1.msra.mxu0 %v1269_v7 }
 0x9a3   :  { %948 = vmatprep.subr.mxu0 %v1275_v9 }
 0x9a4   :  { %949 = vmatpush1.msra.mxu0 %v1284_v12 }
 0x9a5   :  { %950 = vmatprep.subr.mxu0 %v1287_v13 }
 0x9a6   :  { %951 = vmatpush1.msra.mxu0 %v1291_v14 }
 0x9a7   :  { %952 = vmatprep.subr.mxu0 %v1295_v15 }
 0x9a8   :  { %953 = vmatpush1.msra.mxu0 %v1299_v16 }
 0x9a9   :  { %954 = vmatprep.subr.mxu0 %v1303_v17  ;;  %v798_v17 = vrot.slane %v696_v62, 6 }
 0x9aa   :  { %955 = vmatpush1.msra.mxu0 %v1307_v18 }
 0x9ab   :  { %956 = vmatprep.subr.mxu0 %v1311_v19 }
 0x9ac   :  { %957 = vmatpush1.msra.mxu0 %v1315_v20 }
 0xa5d   :  { %v770_v1 = vpop.f32.mrf.mxu0 }
 0xa5e   :  { %v777_v3 = vrot.slane %v770_v1, 6 }
 0xa5f   :  { %v772_v4 = vpop.f32.mrf.mxu0 }
 0xa60   :  { %v781_v5 = vadd.f32 %v777_v3, %v1462_v44  ;;  %v778_v6 = vrot.slane %v772_v4, 6 }
 0xa62   :  { %v1088_v7 = vmul.f32 -1.442695, %v781_v5  ;;  %v782_v9 = vadd.f32 %v778_v6, %v1466_v46 }
 0xa64   :  { %1156 = vpow2.f32 %v1088_v7  ;;  %v1089_v12 = vmul.f32 -1.442695, %v782_v9 }
 0xa66   :  { %1158 = vpow2.f32 %v1089_v12 }
 0xa71   :  { %v1157_v13 = vpop.eup %1156 }
 0xa72   :  { %v789_v14 = vadd.f32 1.0, %v1157_v13 }
 0xa73   :  { %v1159_v15 = vpop.eup %1158 }
 0xa74   :  { %1160 = vrcp.f32 %v789_v14  ;;  %v790_v16 = vadd.f32 1.0, %v1159_v15 }
 0xa76   :  { %1162 = vrcp.f32 %v790_v16 }
 0xa81   :  { %v1161_v18 = vpop.eup %1160 }
 0xa82   :  { %v800_v19 = vmul.f32 %v1161_v18, %v798_v17 }
 0xa83   :  { %v1163_v20 = vpop.eup %1162 }
 0xa84   :  { %v795_v10 = vmul.f32 2.0, %v1163_v20 }
 0xa86   :  { %v1090_v11 = vadd.f32 -1.0, %v795_v10 }
 0xa88   :  { %v801_v21 = vmul.f32 %v1161_v18, %v1090_v11 }
 0xa8a   :  { %803 = vrot.lane.b32.xlu0 %v801_v21, %s1212_s3 }
 0xafc   :  { %v804_v22 = vpop.permute.xlu0 %803 }
 0xafd   :  { %v806_v23 = vadd.f32 %v804_v22, %v800_v19  ;;  %v1100_v19 = vld [vmem:[#allocation2] ss:$0 sm:$0xff] }
 0xaff   :  { %1164 = vtanh.f32 %v806_v23  ;;  %v909_v41 = vrot.slane %v806_v23, 6 }
 0xb0c   :  { %v1165_v24 = vpop.eup %1164 }
 0xb0d   :  { %v808_v26 = vmul.f32 %v1165_v24, %v1163_v20 }
 0xb0f   :  { %v810_v27 = vrot.slane %v808_v26, 2 }
 0xb11   :  { %811 = vrot.lane.b32.xlu1 %v810_v27, %s1212_s3 }
 0xb83   :  { %v812_v30 = vpop.permute.xlu1 %811 }
 0xb84   :  { %1091 = vmatmul.mubr.msk.f32.vlgmr.msra.gmra.mxu1 %vm162_vm2, %v812_v30 }
 0xc44   :  { %v881_v31 = vpop.f32.mrf.mxu1 }
 0xc45   :  { %v888_v33 = vrot.slane %v881_v31, 4 }
 0xc46   :  { %v883_v34 = vpop.f32.mrf.mxu1 }
 0xc47   :  { %v892_v2 = vadd.f32 %v888_v33, %v1462_v44  ;;  %v889_v35 = vrot.slane %v883_v34, 4 }
 0xc49   :  { %v1092_v36 = vmul.f32 -1.442695, %v892_v2  ;;  %v893_v37 = vadd.f32 %v889_v35, %v1466_v46 }
 0xc4b   :  { %1166 = vpow2.f32 %v1092_v36  ;;  %v1093_v38 = vmul.f32 -1.442695, %v893_v37 }
 0xc4d   :  { %1168 = vpow2.f32 %v1093_v38 }
 0xc58   :  { %v1167_v28 = vpop.eup %1166 }
 0xc59   :  { %v900_v39 = vadd.f32 1.0, %v1167_v28 }
 0xc5a   :  { %v1169_v32 = vpop.eup %1168 }
 0xc5b   :  { %1170 = vrcp.f32 %v900_v39  ;;  %v901_v40 = vadd.f32 1.0, %v1169_v32 }
 0xc5d   :  { %1172 = vrcp.f32 %v901_v40 }
 0xc68   :  { %v1171_v42 = vpop.eup %1170 }
 0xc69   :  { %v911_v43 = vmul.f32 %v1171_v42, %v909_v41 }
 0xc6a   :  { %v1173_v45 = vpop.eup %1172 }
 0xc6b   :  { %v906_v47 = vmul.f32 2.0, %v1173_v45 }
 0xc6d   :  { %v1094_v48 = vadd.f32 -1.0, %v906_v47 }
 0xc6f   :  { %v912_v49 = vmul.f32 %v1171_v42, %v1094_v48 }
 0xc71   :  { %914 = vrot.lane.b32.xlu0 %v912_v49, %s1212_s3 }
 0xce3   :  { %v915_v50 = vpop.permute.xlu0 %914 }
 0xce4   :  { %v917_v51 = vadd.f32 %v915_v50, %v911_v43 }
 0xce6   :  { %1174 = vtanh.f32 %v917_v51  ;;  %v1020_v3 = vrot.slane %v917_v51, 6 }
 0xcf3   :  { %v1175_v52 = vpop.eup %1174 }
 0xcf4   :  { %v919_v53 = vmul.f32 %v1175_v52, %v1173_v45 }
 0xcf6   :  { %v921_v56 = vrot.slane %v919_v53, 4 }
 0xcf8   :  { %922 = vrot.lane.b32.xlu1 %v921_v56, %s1212_s3 }
 0xcfc   :  { %1037 = vrot.lane.b32.xlu1 %v1099_v54, %s1212_s3 }
 0xd6a   :  { %v923_v25 = vpop.permute.xlu1 %922 }
 0xd6b   :  { %1095 = vmatmul.mubr.msk.f32.vlgmr.msra.gmra.mxu0 %vm162_vm2, %v923_v25 }
 0xd6e   :  { %v1038_v14 = vpop.permute.xlu1 %1037 }
 0xe2b   :  { %v992_v57 = vpop.f32.mrf.mxu0 }
 0xe2c   :  { %v999_v58 = vrot.slane %v992_v57, 2 }
 0xe2d   :  { %v994_v29 = vpop.f32.mrf.mxu0 }
 0xe2e   :  { %v1003_v55 = vadd.f32 %v999_v58, %v1462_v44  ;;  %v1000_v59 = vrot.slane %v994_v29, 2 }
 0xe30   :  { %v1096_v60 = vmul.f32 -1.442695, %v1003_v55  ;;  %v1004_v61 = vadd.f32 %v1000_v59, %v1466_v46 }
 0xe32   :  { %1176 = vpow2.f32 %v1096_v60  ;;  %v1097_v62 = vmul.f32 -1.442695, %v1004_v61 }
 0xe34   :  { %1178 = vpow2.f32 %v1097_v62 }
 0xe3f   :  { %v1177_v63 = vpop.eup %1176 }
 0xe40   :  { %v1011_v0 = vadd.f32 1.0, %v1177_v63 }
 0xe41   :  { %v1179_v8 = vpop.eup %1178 }
 0xe42   :  { %1180 = vrcp.f32 %v1011_v0  ;;  %v1012_v1 = vadd.f32 1.0, %v1179_v8 }
 0xe44   :  { %1182 = vrcp.f32 %v1012_v1 }
 0xe4f   :  { %v1181_v4 = vpop.eup %1180 }
 0xe50   :  { %v1022_v5 = vmul.f32 %v1181_v4, %v1020_v3 }
 0xe51   :  { %v1183_v6 = vpop.eup %1182 }
 0xe52   :  { %v1017_v7 = vmul.f32 2.0, %v1183_v6 }
 0xe54   :  { %v1098_v9 = vadd.f32 -1.0, %v1017_v7 }
 0xe56   :  { %v1023_v44 = vmul.f32 %v1181_v4, %v1098_v9 }
 0xe58   :  { %1025 = vrot.lane.b32.xlu0 %v1023_v44, %s1212_s3 }
 0xeca   :  { %v1026_v12 = vpop.permute.xlu0 %1025 }
 0xecb   :  { %v1028_v46 = vadd.f32 %v1026_v12, %v1022_v5 }
 0xecd   :  { %1184 = vtanh.f32 %v1028_v46 }
 0xeda   :  { %v1185_v13 = vpop.eup %1184 }
 0xedb   :  { %v1030_v15 = vmul.f32 %v1185_v13, %v1183_v6 }
 0xedd   :  { %v1040_v16 = vmul.f32 %v1038_v14, %v1030_v15 }
 0xedf   :  { %1042 = vrot.lane.b32.xlu0 %v1040_v16, %s1212_s3 }
 0xf51   :  { %v1043_v17 = vpop.permute.xlu0 %1042 }
 0xf52   :  { %v1046_v18 = vsel %vm1045_vm3, %v1043_v17, 0.0 }
 0xf53   :  { %1047 = vadd.xlane.f32.xlu1 %v1046_v18 }
 0xfdc   :  { %v1048_v20 = vpop.xlane.xlu1 %1047 }
 0xfdd   :  { %v1056_v10 = vadd.f32 %v1100_v19, %v1048_v20 }
 0xfdf   :  { %1058 = vst.msk [vmem:[%s1516_s6 - $0x6] sm:$0xc0] %vm1057_vm4, %v1056_v10 }
 0xfe0   :  { %1063 = vsyncpa [#allocation4], 1 }

</bundles_post_ra>
